<compile_context>
chip_gen: v7x
topology: tpu7x:2x2x1
jax: 0.10.0
libtpu: 0.0.40
codegen_flags: <defaults>
</compile_context>

<pallas_src>
import functools

import jax
import jax.numpy as jnp
from jax.experimental import pallas as pl
from jax.experimental.pallas import tpu as pltpu


def _round_up(x, m):
    return ((x + m - 1) // m) * m


def _largest_divisor_leq(n, k):
    k = max(1, min(n, k))
    for d in range(k, 0, -1):
        if n % d == 0:
            return d
    return 1


def _make_aggregate_kernel(mxu_dtype):
    def kernel(fmap_ref, attn_ref, wv_ref, wp_ref, out_ref):
        # fmap_ref : (nb, dim, thw)        spatial axis in lanes -> lane-dense
        # attn_ref : (nb, inner_dim, thw)
        # wv_ref   : (inner_dim, dim)      resident (constant index map)
        # wp_ref   : (dim, inner_dim)      already scaled by sigmoid(gamma)
        # out_ref  : (nb, dim, thw)
        wv = wv_ref[...]
        wp = wp_ref[...]
        nb = fmap_ref.shape[0]
        # nb is a small static int; unrolled 2-D matmuls avoid the batched-dot
        # transpose and keep each dot a plain MXU matmul.
        for i in range(nb):
            f = fmap_ref[i]                       # (dim, thw)
            a = attn_ref[i]                       # (inner_dim, thw)
            x = f if mxu_dtype is None else f.astype(mxu_dtype)
            v = jnp.dot(wv, x, preferred_element_type=jnp.float32)
            o = a.astype(jnp.float32) * v
            o = o if mxu_dtype is None else o.astype(mxu_dtype)
            p = jnp.dot(wp, o, preferred_element_type=jnp.float32)
            # residual add in f32, single down-cast at the store
            out_ref[i] = (f.astype(jnp.float32) + p).astype(out_ref.dtype)

    return kernel


def _choose_tiles(B, HW, thw_target):
    """Pick (nb, thw): lane-dense spatial tile + batch packing for small maps."""
    assert thw_target % 128 == 0, "thw_target must be a multiple of 128"
    if HW % 128 == 0:
        thw = min(HW, thw_target)
    elif HW < 128:
        thw = HW                       # full extent (only legal small option)
    else:
        # pad up to the next 128-multiple (or tile at thw_target with a tail);
        # keeps in-kernel stores lane-dense, Pallas masks the HBM writeback.
        thw = min(_round_up(HW, 128), thw_target)

    # Pack batch elements when a single spatial block is small (amortize the
    # per-grid-step overhead). Cap the unroll at 8.
    target_nb = min(8, max(1, thw_target // max(thw, 1)))
    nb = _largest_divisor_leq(B, target_nb)

    # Make sure the grid exposes >= 2 steps along a parallel axis when it can
    # (v7x has 2 TensorCores fed by sharding parallel grid axes).
    n_b, n_s = pl.cdiv(B, nb), pl.cdiv(HW, thw)
    if n_b * n_s < 2:
        if nb > 1:
            nb = _largest_divisor_leq(B, max(1, nb // 2))
        elif HW > 128 and thw > 128:
            thw = _round_up(pl.cdiv(HW, 2), 128)
    return nb, thw


def aggregate_pallas(attn, fmap, wv, wp, gamma, *, thw_target=4096,
                     mxu_dtype=None):
    """Aggregate.forward as a fused Pallas kernel, NCHW-native.

    attn : (B, inner_dim, H, W)
    fmap : (B, dim, H, W)
    wv   : (inner_dim, dim, 1, 1)  -- nn.Conv2d(dim, inner_dim, 1, bias=False).weight
    wp   : (dim, inner_dim, 1, 1)  -- nn.Conv2d(inner_dim, dim, 1, bias=False).weight
    gamma: (1,)
    mxu_dtype: optional dtype (e.g. jnp.bfloat16) for the two matmuls
               (operands cast, accumulation stays f32). Recommended on v7x.
    """
    B, dim, H, W = fmap.shape
    inner_dim = attn.shape[1]
    HW = H * W

    # NCHW -> (B, C, H*W): layout-preserving reshape, no data movement.
    fmap3 = fmap.reshape(B, dim, HW)
    attn3 = attn.reshape(B, inner_dim, HW)

    # Conv2d 1x1 weights -> (Cout, Cin); fold sigmoid(gamma) into Wp (in f32).
    wv2 = wv.reshape(inner_dim, dim).astype(jnp.float32)
    g = jax.nn.sigmoid(gamma.astype(jnp.float32)).reshape(())
    wp2 = wp.reshape(dim, inner_dim).astype(jnp.float32) * g
    if mxu_dtype is not None:
        wv2 = wv2.astype(mxu_dtype)
        wp2 = wp2.astype(mxu_dtype)

    nb, thw = _choose_tiles(B, HW, thw_target)
    n_b = pl.cdiv(B, nb)
    n_s = pl.cdiv(HW, thw)
    grid = (n_b, n_s)

    # Rough per-step VMEM; only override the scoped limit if the default
    # (16 MiB on v5e) would be exceeded by double-buffering.
    elem = jnp.dtype(fmap.dtype).itemsize
    per_step = nb * thw * (2 * dim + inner_dim) * elem
    w_bytes = wv2.size * wv2.dtype.itemsize + wp2.size * wp2.dtype.itemsize
    vmem_needed = 2 * per_step + 2 * w_bytes + (1 << 20)
    cp_kwargs = dict(dimension_semantics=("parallel", "parallel"))
    if vmem_needed > (14 << 20):
        cp_kwargs["vmem_limit_bytes"] = int(min(vmem_needed + (4 << 20), 96 << 20))

    kernel = _make_aggregate_kernel(mxu_dtype)

    out3 = pl.pallas_call(
        kernel,
        out_shape=jax.ShapeDtypeStruct((B, dim, HW), fmap.dtype),
        grid_spec=pltpu.PrefetchScalarGridSpec(
            num_scalar_prefetch=0,
            grid=grid,
            in_specs=[
                pl.BlockSpec((nb, dim, thw), lambda b, s: (b, 0, s)),        # fmap
                pl.BlockSpec((nb, inner_dim, thw), lambda b, s: (b, 0, s)),  # attn
                pl.BlockSpec((inner_dim, dim), lambda b, s: (0, 0)),         # Wv
                pl.BlockSpec((dim, inner_dim), lambda b, s: (0, 0)),         # Wp*sig(gamma)
            ],
            out_specs=pl.BlockSpec((nb, dim, thw), lambda b, s: (b, 0, s)),
        ),
        compiler_params=pltpu.CompilerParams(**cp_kwargs),
    )(fmap3, attn3, wv2, wp2)

    return out3.reshape(B, dim, H, W)


def aggregate_ref(attn, fmap, wv, wp, gamma):
    """Plain-JAX reference mirroring the PyTorch forward (NCHW)."""
    wv2 = wv.reshape(wv.shape[0], wv.shape[1])   # (inner_dim, dim)
    wp2 = wp.reshape(wp.shape[0], wp.shape[1])   # (dim, inner_dim)
    v = jnp.einsum('oc,bchw->bohw', wv2, fmap)
    out = attn * v
    out = jnp.einsum('oc,bchw->bohw', wp2, out)
    return fmap + jax.nn.sigmoid(gamma[0]) * out


if __name__ == "__main__":
    key = jax.random.PRNGKey(0)
    k1, k2, k3, k4, k5, k6, k7, k8 = jax.random.split(key, 8)

    # Match the real module: self.attn = Aggregate(64, 128)  (dim=64, inner=128)
    B, dim, inner_dim, H, W = 2, 64, 128, 16, 16

    fmap = jax.random.normal(k1, (B, dim, H, W), dtype=jnp.float32)
    attn = jax.random.normal(k2, (B, inner_dim, H, W), dtype=jnp.float32)

    # nn.Conv2d(dim, inner_dim, 1, bias=False) / nn.Conv2d(inner_dim, dim, 1, bias=False)
    wv = 0.1 * jax.random.normal(k3, (inner_dim, dim, 1, 1), dtype=jnp.float32)
    wp = 0.1 * jax.random.normal(k4, (dim, inner_dim, 1, 1), dtype=jnp.float32)
    gamma = jnp.full((1,), 0.5, dtype=jnp.float32)   # torch.ones(1) * 0.5

    # 1) Standard case (HW=256): full-extent spatial tile, 2-step parallel grid.
    out = jax.block_until_ready(aggregate_pallas(attn, fmap, wv, wp, gamma))
    ref = aggregate_ref(attn, fmap, wv, wp, gamma)
    assert out.shape == (B, dim, H, W)
    assert jnp.allclose(out, ref, atol=1e-4, rtol=1e-4), "mismatch vs reference"

    # 2) Odd spatial size (HW=240) with a forced 128-lane tile -> masked tail.
    H2, W2 = 12, 20
    fmap2 = jax.random.normal(k5, (B, dim, H2, W2), dtype=jnp.float32)
    attn2 = jax.random.normal(k6, (B, inner_dim, H2, W2), dtype=jnp.float32)
    out2 = jax.block_until_ready(
        aggregate_pallas(attn2, fmap2, wv, wp, gamma, thw_target=128))
    ref2 = aggregate_ref(attn2, fmap2, wv, wp, gamma)
    assert jnp.allclose(out2, ref2, atol=1e-4, rtol=1e-4), "mismatch (tail case)"

    # 3) Small feature map + larger batch -> batch-axis blocking (nb > 1).
    B3, H3, W3 = 8, 8, 8
    fmap3 = jax.random.normal(k7, (B3, dim, H3, W3), dtype=jnp.float32)
    attn3 = jax.random.normal(k8, (B3, inner_dim, H3, W3), dtype=jnp.float32)
    out3 = jax.block_until_ready(aggregate_pallas(attn3, fmap3, wv, wp, gamma))
    ref3 = aggregate_ref(attn3, fmap3, wv, wp, gamma)
    assert jnp.allclose(out3, ref3, atol=1e-4, rtol=1e-4), "mismatch (batch-blocked)"

    # 4) bf16 matmul operands (v7x recommendation), f32 accumulation/residual.
    out4 = jax.block_until_ready(
        aggregate_pallas(attn, fmap, wv, wp, gamma, mxu_dtype=jnp.bfloat16))
    assert jnp.allclose(out4, ref, atol=2e-2, rtol=2e-2), "mismatch (bf16 MXU)"

    print("KERNEL_OK")
</pallas_src>

<mosaic_0001>
module attributes {stable_mosaic.version = 11 : i64} {
  func.func @kernel(%arg0: i32, %arg1: i32, %arg2: memref<1x64x256xf32, #tpu.memory_space<vmem>>, %arg3: memref<1x128x256xf32, #tpu.memory_space<vmem>>, %arg4: memref<128x64xf32, #tpu.memory_space<vmem>>, %arg5: memref<64x128xf32, #tpu.memory_space<vmem>>, %arg6: memref<1x64x256xf32, #tpu.memory_space<vmem>>) attributes {dimension_semantics = [#tpu.dimension_semantics<parallel>, #tpu.dimension_semantics<parallel>], iteration_bounds = array<i64: 2, 1>, scalar_prefetch = 0 : i64, scratch_operands = 0 : i64, tpu.core_type = #tpu.core_type<tc>, window_params = [{transform_indices = @transform_0, window_bounds = array<i64: 1, 64, 256>}, {transform_indices = @transform_1, window_bounds = array<i64: 1, 128, 256>}, {pipeline_mode = #tpu.pipeline_mode<synchronous>, transform_indices = @transform_2, window_bounds = array<i64: 128, 64>}, {pipeline_mode = #tpu.pipeline_mode<synchronous>, transform_indices = @transform_3, window_bounds = array<i64: 64, 128>}, {transform_indices = @transform_4, window_bounds = array<i64: 1, 64, 256>}]} {
    %c0 = arith.constant 0 : index
    %c0_0 = arith.constant 0 : index
    %0 = vector.load %arg4[%c0, %c0_0] : memref<128x64xf32, #tpu.memory_space<vmem>>, vector<128x64xf32>
    %c0_1 = arith.constant 0 : index
    %c0_2 = arith.constant 0 : index
    %1 = vector.load %arg5[%c0_1, %c0_2] : memref<64x128xf32, #tpu.memory_space<vmem>>, vector<64x128xf32>
    %c0_3 = arith.constant 0 : index
    %c0_4 = arith.constant 0 : index
    %c0_5 = arith.constant 0 : index
    %2 = vector.load %arg2[%c0_3, %c0_4, %c0_5] : memref<1x64x256xf32, #tpu.memory_space<vmem>>, vector<1x64x256xf32>
    %3 = vector.shape_cast %2 : vector<1x64x256xf32> to vector<64x256xf32>
    %c0_6 = arith.constant 0 : index
    %c0_7 = arith.constant 0 : index
    %c0_8 = arith.constant 0 : index
    %4 = vector.load %arg3[%c0_6, %c0_7, %c0_8] : memref<1x128x256xf32, #tpu.memory_space<vmem>>, vector<1x128x256xf32>
    %5 = vector.shape_cast %4 : vector<1x128x256xf32> to vector<128x256xf32>
    %cst = arith.constant dense<0.000000e+00> : vector<128x256xf32>
    %6 = tpu.matmul %0, %3, %cst {dimension_numbers = #tpu.dot_dimension_numbers<[1], [0], [0], [1], [0, 0, 1, 1], [], []>} : vector<128x64xf32>, vector<64x256xf32>, vector<128x256xf32> -> vector<128x256xf32>
    %7 = arith.mulf %5, %6 : vector<128x256xf32>
    %cst_9 = arith.constant dense<0.000000e+00> : vector<64x256xf32>
    %8 = tpu.matmul %1, %7, %cst_9 {dimension_numbers = #tpu.dot_dimension_numbers<[1], [0], [0], [1], [0, 0, 1, 1], [], []>} : vector<64x128xf32>, vector<128x256xf32>, vector<64x256xf32> -> vector<64x256xf32>
    %9 = arith.addf %3, %8 : vector<64x256xf32>
    %c0_10 = arith.constant 0 : index
    %c0_11 = arith.constant 0 : index
    %c0_12 = arith.constant 0 : index
    %10 = vector.load %arg6[%c0_10, %c0_11, %c0_12] : memref<1x64x256xf32, #tpu.memory_space<vmem>>, vector<1x64x256xf32>
    %11 = vector.shape_cast %10 : vector<1x64x256xf32> to vector<64x256xf32>
    %12 = vector.shape_cast %9 : vector<64x256xf32> to vector<1x64x256xf32>
    tpu.vector_store %arg6[%c0_10, %c0_11, %c0_12], %12 {strides = array<i32>} : memref<1x64x256xf32, #tpu.memory_space<vmem>>, vector<1x64x256xf32>,
    return
  }
  func.func @transform_0(%arg0: i32, %arg1: i32) -> (i32, i32, i32) {
    %c0_i32 = arith.constant 0 : i32
    %c0_i32_0 = arith.constant 0 : i32
    return %arg0, %c0_i32, %arg1 : i32, i32, i32
  }
  func.func @transform_1(%arg0: i32, %arg1: i32) -> (i32, i32, i32) {
    %c0_i32 = arith.constant 0 : i32
    %c0_i32_0 = arith.constant 0 : i32
    return %arg0, %c0_i32, %arg1 : i32, i32, i32
  }
  func.func @transform_2(%arg0: i32, %arg1: i32) -> (i32, i32) {
    %c0_i32 = arith.constant 0 : i32
    %c0_i32_0 = arith.constant 0 : i32
    %c0_i32_1 = arith.constant 0 : i32
    return %c0_i32, %c0_i32_0 : i32, i32
  }
  func.func @transform_3(%arg0: i32, %arg1: i32) -> (i32, i32) {
    %c0_i32 = arith.constant 0 : i32
    %c0_i32_0 = arith.constant 0 : i32
    %c0_i32_1 = arith.constant 0 : i32
    return %c0_i32, %c0_i32_0 : i32, i32
  }
  func.func @transform_4(%arg0: i32, %arg1: i32) -> (i32, i32, i32) {
    %c0_i32 = arith.constant 0 : i32
    %c0_i32_0 = arith.constant 0 : i32
    return %arg0, %c0_i32, %arg1 : i32, i32, i32
  }
}

</mosaic_0001>

<bundles_post_ra>
// kernel: tpu_custom_call.1
= control target key start
LH: loop header
LB: loop body
LE: loop exit
PB: predicated region body
PF: predicated region fallthrough
CT: control target
= control target key end

     0   :  { %9 = vsyncpa [#allocation3], 0  ;;  %s1690_s0 = inlined_call_operand.hbm [shape: f32[2,64,256], index: 0, kind: input, shape index: {}]   ;;  %s1691_s1 = inlined_call_operand.hbm [shape: f32[2,128,256], index: 1, kind: input, shape index: {}]   ;;  %s1692_s2 = inlined_call_operand.vmem [shape: f32[128,64], index: 2, kind: input, shape index: {}]   ;;  %s1693_s3 = inlined_call_operand.vmem [shape: f32[64,128], index: 3, kind: input, shape index: {}]   ;;  %s1694_s4 = inlined_call_operand.hbm [shape: f32[2,64,256], index: 4, kind: output, shape index: {}]  }
   0x1   :  { %11 = vsyncpa [#allocation3 + $0x1], 0 }
   0x2   :  { %12 = vsyncpa [#allocation6], 0 }
   0x3   :  { %14 = vsyncpa [#allocation6 + $0x1], 0 }
   0x4   :  { %15 = vsyncpa [#allocation4], 0 }
   0x5   :  { %17 = vsyncpa [#allocation4 + $0x1], 0  ;;  %s1208_s15 = smov 0   ;;  %s1210_s16 = smov 0  }
   0x6   :  { %s1212_s17 = smov 0   ;;  %s1214_s18 = smov 0  }
   0x7   :  { %s1216_s19 = smov 0   ;;  %s1218_s20 = smov 0  }
   0x8 LB: > { %s869_s21 = sadd.s32 4294967295, %s1173_s20   ;;  %s870_s22 = sadd.s32 4294967294, %s1173_s20   ;;  %s1173_s20 = sphi %s1218_s20, %s23_s20   ;;  %s1169_s19 = sphi %s1216_s19, %s1714_s19   ;;  %s1165_s18 = sphi %s1214_s18, %s1713_s18   ;;  %s1161_s17 = sphi %s1212_s17, %s1712_s17   ;;  %s1157_s16 = sphi %s1210_s16, %s1711_s16   ;;  %s1153_s15 = sphi %s1208_s15, %s1710_s15  }
   0x9   : > { %s35_s23 = sadd.s32 1, %s1169_s19  ;;  %s44_s24 = sadd.s32 1, %s1161_s17 }
   0xa   : > { %p37_p0 = scmp.ge.s32.totalorder %s35_s23, 2  ;;  %p51_p1 = scmp.ne.s32.totalorder %s1161_s17, %s1157_s16 }
   0xb   : > { %p52_p2 = scmp.eq.s32.totalorder %s1173_s20, 0  ;;  %p57_p3 = scmp.ne.s32.totalorder %s1157_s16, %s1153_s15 }
   0xc   : > { %s1716_s23 = smov (%p37_p0, %s35_s23), 0  ;;  %p58_p5 = scmp.eq.s32.totalorder %s869_s21, 0 }
   0xd   : > { %p1249_p4 = por %p52_p2, %p51_p1  ;;  %s39_s26 = ssub.s32 %s1169_s19, %s1716_s23 }
   0xe   : > { %p153_p6 = scmp.eq.s32.totalorder %s869_s21, 1  ;;  %p42_p7 = scmp.eq.s32.totalorder %s39_s26, 0 }
   0xf   : > { %p1255_p8 = por %p58_p5, %p57_p3  ;;  %p159_p10 = scmp.eq.s32.totalorder %s870_s22, 1 }
  0x10   : > { %p1259_p9 = por %p153_p6, %p51_p1  ;;  %p972_p13 = scmp.lt.s32.totalorder %s1173_s20, 2 }
  0x11   : > { %s1699_s27 = scalar_select %p1255_p8, 1, 0 }
  0x12   : > { %s1700_s28 = scalar_select %p1259_p9, 1, 0 }
  0x13   : > { %s1264_s29 = scalar_select %p42_p7, %s1161_s17, %s44_s24  }
  0x14   : > { %p1266_p11 = por %p159_p10, %p57_p3  ;;  %s1273_s5 = sand.u32 1, %s1161_s17  }
  0x15   : > { %s873_s6 = sshll.u32 %s1273_s5, 7  ;;  %s904_s7 = sshll.u32 %s1169_s19, 11 }
  0x16   : > { %s1701_s30 = scalar_select %p1266_p11, 1, 0 }
  0x17   : > { %s1280_s10 = scalar_lea.hbm %s1690_s0, %s904_s7  ;;  %s189_s11 = scalar_lea.vmem [#allocation2], %s873_s6 }
  0x18   : > { %s198_s12 = sshll.u32 %s189_s11, 4  ;;  %p1286_p0 = pnand %p972_p13, %p1249_p4  ;;  %s1282_s12 = int_to_ptr.vmem [resolvable:$true] %s198_s12 }
  0x19   : > { %s186_s14 = scalar_lea.sflag [#allocation3], %s1273_s5  ;;  %s1027_s21 = scalar_lea.hbm %s1280_s10, 2048 }
  0x1a   : > { %p1028_p2 = scmp.ne.s32.totalorder %s1280_s10, %s1027_s21  ;;  %p1029_p3 = pneg %p1286_p0 }
  0x1b   : > { %s1032_s25 = scalar_lea.hbm %s1690_s0, 4096  ;;  %p1033_p4 = scmp.lt.u32.totalorder %s1280_s10, %s1690_s0 }
  0x1c   : > { %p1030_p5 = pnand %p1029_p3, %p1028_p2  ;;  %p1034_p7 = scmp.lt.u32.totalorder %s1032_s25, %s1027_s21 }
  0x1d   : > { %p1036_p13 = scmp.lt.u32.totalorder %s1027_s21, %s1280_s10 }
  0x1e   : > { %p1031_p6 = pneg %p1030_p5  ;;  %p1035_p10 = por %p1034_p7, %p1033_p4 }
  0x20   : > { %p1037_p12 = por %p1036_p13, %p1035_p10 }
  0x22   : > { %p1038_p1 = pnand %p1037_p12, %p1031_p6 }
  0x24   : > { %1041 = shalt.err (!%p1038_p1)
}
  0x25   : > { %s1042_s7 = scalar_lea.vmem %s1282_s12, 2048  ;;  %s1175_s8 = smov [#allocation2]  }
  0x26   : > { %p1043_p2 = scmp.ne.s32.totalorder %s1282_s12, %s1042_s7  ;;  %s1047_s9 = sshll.u32 %s1175_s8, 4  ;;  %s1048_s9 = int_to_ptr.vmem [resolvable:$false] %s1047_s9 }
  0x27   : > { %s1049_s11 = scalar_lea.vmem %s1048_s9, 4096  ;;  %p1050_p9 = scmp.lt.s32.totalorder %s1282_s12, %s1048_s9 }
  0x28   : > { %p1045_p5 = pnand %p1043_p2, %p1029_p3  ;;  %p1051_p4 = scmp.lt.s32.totalorder %s1049_s11, %s1042_s7 }
  0x2a   : > { %p1046_p11 = pneg %p1045_p5  ;;  %p1052_p7 = por %p1051_p4, %p1050_p9 }
  0x2c   : > { %p1053_p10 = pnand %p1052_p7, %p1046_p11 }
  0x2e   : > { %1056 = shalt.err (!%p1053_p10)
}
  0x2f   : > { %s1696_s21 = smov 256   ;;  %s1177_s22 = smov 16  }
  0x30   : > { %964 = dma.hbm_to_vmem [thread:$0]  (!%p1286_p0), %s1280_s10, 2048, %s1282_s12, %s186_s14, %s1696_s21, %s1696_s21, %s1177_s22  }
  0x31   : > { %p229_p9 = scmp.lt.s32.totalorder %s1173_s20, 3  ;;  %s876_s24 = sshll.u32 %s1273_s5, 8 }
  0x32   : > { %s905_s25 = sshll.u32 %s1169_s19, 12  ;;  %p1703_p11 = scmp.ge.s32.totalorder %s1173_s20, 1 }
  0x33   : > { %s1334_s8 = scalar_lea.hbm %s1691_s1, %s905_s25  ;;  %s212_s9 = scalar_lea.vmem [#allocation5], %s876_s24 }
  0x34   : > { %p1327_p12 = pnand %p1703_p11, %p229_p9  ;;  %s221_s11 = sshll.u32 %s212_s9, 4  ;;  %s1336_s11 = int_to_ptr.vmem [resolvable:$true] %s221_s11 }
  0x35   : > { %s209_s10 = scalar_lea.sflag [#allocation6], %s1273_s5  ;;  %s1057_s12 = scalar_lea.hbm %s1334_s8, 4096 }
  0x36   : > { %p1058_p1 = scmp.ne.s32.totalorder %s1334_s8, %s1057_s12  ;;  %s1062_s25 = scalar_lea.hbm %s1691_s1, 8192 }
  0x37   : > { %p1063_p2 = scmp.lt.u32.totalorder %s1334_s8, %s1691_s1  ;;  %p1064_p5 = scmp.lt.u32.totalorder %s1062_s25, %s1057_s12 }
  0x38   : > { %p1060_p6 = pnand %p1058_p1, %p1029_p3  ;;  %p1066_p7 = scmp.lt.u32.totalorder %s1057_s12, %s1334_s8 }
  0x39   : > { %p1065_p4 = por %p1064_p5, %p1063_p2 }
  0x3a   : > { %p1061_p13 = pneg %p1060_p6 }
  0x3b   : > { %p1067_p10 = por %p1066_p7, %p1065_p4 }
  0x3d   : > { %p1068_p9 = pnand %p1067_p10, %p1061_p13 }
  0x3f   : > { %1071 = shalt.err (!%p1068_p9)
}
  0x40   : > { %s1072_s24 = scalar_lea.vmem %s1336_s11, 4096  ;;  %s1178_s21 = smov [#allocation5]  }
  0x41   : > { %p1073_p11 = scmp.ne.s32.totalorder %s1336_s11, %s1072_s24  ;;  %s1077_s9 = sshll.u32 %s1178_s21, 4  ;;  %s1078_s9 = int_to_ptr.vmem [resolvable:$false] %s1077_s9 }
  0x42   : > { %s1079_s14 = scalar_lea.vmem %s1078_s9, 8192  ;;  %p1080_p8 = scmp.lt.s32.totalorder %s1336_s11, %s1078_s9 }
  0x43   : > { %p1075_p1 = pnand %p1073_p11, %p1029_p3  ;;  %p1081_p2 = scmp.lt.s32.totalorder %s1079_s14, %s1072_s24 }
  0x45   : > { %p1076_p6 = pneg %p1075_p1  ;;  %p1082_p5 = por %p1081_p2, %p1080_p8 }
  0x47   : > { %p1083_p4 = pnand %p1082_p5, %p1076_p6 }
  0x49   : > { %1086 = shalt.err (!%p1083_p4)
}
  0x4a   : > { %s1705_s12 = smov 256   ;;  %233 = sbr.rel (%p1327_p12) target bundleno = 643 (0x283), region = 36 }
  0x4b   : > { %967 = dma.hbm_to_vmem [thread:$0]  (!%p1286_p0), %s1334_s8, 4096, %s1336_s11, %s209_s10, %s1705_s12, %s1705_s12, %s1177_s22  }
  0x4c   : > { %s1370_s25 = sand.u32 (!%p1327_p12), 1, %s1157_s16   ;;  %p1706_p8 = scmp.ne.s32.totalorder (!%p1327_p12), %s1699_s27, 0 }
  0x4d   : > { %s880_s6 = sshll.u32 (!%p1327_p12), %s1370_s25, 7  ;;  %s236_s13 = scalar_lea.sflag (!%p1327_p12), [#allocation3], %s1370_s25 }
  0x4e   : > { %s1376_s7 = scalar_lea.vmem (!%p1327_p12), [#allocation2], %s880_s6 }
  0x51   : > { %1140 = dma.done.wait (%p1706_p8), %s236_s13, 2048  }
  0x52   : > { %1142 = vsyncadd (%p1706_p8), %s236_s13, 4294965248  ;;  %s881_s5 = sshll.u32 %s1370_s25, 8  ;;  %s245_s22 = scalar_lea.sflag [#allocation6], %s1370_s25 }
  0x53   : > { %s1384_s26 = scalar_lea.vmem [#allocation5], %s881_s5 }
  0x54   : > { %1144 = dma.done.wait (%p1706_p8), %s245_s22, 4096  }
  0x55   : > { %1146 = vsyncadd (%p1706_p8), %s245_s22, 4294963200  ;;  %v1179_v0 = vmov 0.0   ;;  %v1393_v1 = vld [vmem:[%s1376_s7 + $0x8] sm:$0xff]  ;;  %v1396_v2 = vld [vmem:[%s1376_s7 + $0x18] sm:$0xff]  ;;  %vm353_vm0 = vcmask 523264   ;;  %s1602_s12 = scalar_lea.vmem [#allocation7], %s880_s6 }
  0x56   : > { %466 = vmatprep.mubr.f32.mxu0 %v1179_v0  ;;  %659 = vmatprep.mubr.f32.mxu1 %v1179_v0  ;;  %v1399_v3 = vld [vmem:[%s1376_s7] sm:$0xff]  ;;  %v907_v4 = vpack.c.bf16 %v1396_v2, %v1393_v1  ;;  %v1404_v5 = vld [vmem:[%s1376_s7 + $0x10] sm:$0xff]  ;;  %v1407_v6 = vld [vmem:[%s1376_s7 + $0x28] sm:$0xff]  ;;  %s906_s6 = sshll.u32 %s1165_s18, 11  ;;  %s756_s13 = sshll.u32 %s1602_s12, 4  ;;  %s1638_s13 = int_to_ptr.vmem [resolvable:$true] %s756_s13 }
  0x57   : > { %v1410_v7 = vld [vmem:[%s1376_s7 + $0x38] sm:$0xff]  ;;  %v909_v8 = vpack.c.bf16 %v1404_v5, %v1399_v3  ;;  %v1417_v10 = vld [vmem:[%s1376_s7 + $0x20] sm:$0xff]  ;;  %v1420_v11 = vld [vmem:[%s1376_s7 + $0x30] sm:$0xff]  ;;  %s1636_s5 = scalar_lea.hbm %s1694_s4, %s906_s6  ;;  %s741_s18 = scalar_lea.sflag [#allocation4], %s1370_s25 }
  0x58   : > { %v911_v9 = vpack.c.bf16 %v1410_v7, %v1407_v6  ;;  %v1423_v12 = vld [vmem:[%s1376_s7 + $0x48] sm:$0xff]  ;;  %908 = vmatprep.subr.bf16.mxu0 %v907_v4  ;;  %v1426_v13 = vld [vmem:[%s1376_s7 + $0x58] sm:$0xff]  ;;  %v913_v14 = vpack.c.bf16 %v1420_v11, %v1417_v10  ;;  %v1433_v16 = vld [vmem:[%s1376_s7 + $0x40] sm:$0xff]  ;;  %s1087_s22 = scalar_lea.vmem %s1638_s13, 2048  ;;  %p1707_p3 = scmp.ne.s32.totalorder %s1700_s28, 0 }
  0x59   : > { %910 = vmatpush1.bf16.msra.mxu0 %v909_v8  ;;  %v915_v15 = vpack.c.bf16 %v1426_v13, %v1423_v12  ;;  %v1436_v17 = vld [vmem:[%s1376_s7 + $0x50] sm:$0xff]  ;;  %v1439_v18 = vld [vmem:[%s1376_s7 + $0x68] sm:$0xff]  ;;  %v1442_v19 = vld [vmem:[%s1376_s7 + $0x78] sm:$0xff]  ;;  %p1088_p0 = scmp.ne.s32.totalorder %s1638_s13, %s1087_s22  ;;  %s1180_s27 = smov [#allocation7]  }
  0x5a   : > { %912 = vmatprep.subr.bf16.mxu0 %v911_v9  ;;  %v917_v20 = vpack.c.bf16 %v1436_v17, %v1433_v16  ;;  %v919_v21 = vpack.c.bf16 %v1442_v19, %v1439_v18  ;;  %v1449_v22 = vld [vmem:[%s1376_s7 + $0x60] sm:$0xff]  ;;  %v1452_v23 = vld [vmem:[%s1376_s7 + $0x70] sm:$0xff]  ;;  %v282_v26 = vld [vmem:[%s1692_s2 + $0x8] sm:$0xff]  ;;  %s1091_s8 = sshll.u32 %s1180_s27, 4  ;;  %s1092_s8 = int_to_ptr.vmem [resolvable:$false] %s1091_s8 }
  0x5b   : > { %v921_v24 = vpack.c.bf16 %v1452_v23, %v1449_v22  ;;  %v281_v25 = vld [vmem:[%s1692_s2] sm:$0xff]  ;;  %v283_v27 = vld [vmem:[%s1692_s2 + $0x10] sm:$0xff]  ;;  %v284_v28 = vld [vmem:[%s1692_s2 + $0x18] sm:$0xff]  ;;  %p1089_p12 = pnand %p1088_p0, %p1707_p3  ;;  %s1093_s11 = scalar_lea.vmem %s1092_s8, 4096 }
  0x5c   : > { %v285_v29 = vld [vmem:[%s1692_s2 + $0x20] sm:$0xff]  ;;  %v286_v30 = vld [vmem:[%s1692_s2 + $0x28] sm:$0xff]  ;;  %v287_v31 = vld [vmem:[%s1692_s2 + $0x30] sm:$0xff]  ;;  %p1094_p7 = scmp.lt.s32.totalorder %s1638_s13, %s1092_s8  ;;  %p1095_p10 = scmp.lt.s32.totalorder %s1093_s11, %s1087_s22 }
  0x5d   : > { %914 = vmatpush1.bf16.msra.mxu0 %v913_v14  ;;  %v288_v32 = vld [vmem:[%s1692_s2 + $0x38] sm:$0xff]  ;;  %v289_v33 = vld [vmem:[%s1692_s2 + $0x40] sm:$0xff]  ;;  %v290_v34 = vld [vmem:[%s1692_s2 + $0x48] sm:$0xff]  ;;  %p1090_p13 = pneg %p1089_p12 }
  0x5e   : > { %916 = vmatprep.subr.bf16.mxu0 %v915_v15  ;;  %v291_v35 = vld [vmem:[%s1692_s2 + $0x50] sm:$0xff]  ;;  %v292_v36 = vld [vmem:[%s1692_s2 + $0x58] sm:$0xff]  ;;  %v293_v37 = vld [vmem:[%s1692_s2 + $0x60] sm:$0xff]  ;;  %p1096_p9 = por %p1095_p10, %p1094_p7 }
  0x5f   : > { %v294_v38 = vld [vmem:[%s1692_s2 + $0x68] sm:$0xff]  ;;  %v295_v39 = vld [vmem:[%s1692_s2 + $0x70] sm:$0xff]  ;;  %v296_v40 = vld [vmem:[%s1692_s2 + $0x78] sm:$0xff] }
  0x60   : > { %v321_v43 = vld [vmem:[%s1384_s26] sm:$0xff]  ;;  %v323_v44 = vld [vmem:[%s1384_s26 + $0x10] sm:$0xff]  ;;  %v322_v45 = vld [vmem:[%s1384_s26 + $0x8] sm:$0xff]  ;;  %p1097_p11 = pnand %p1096_p9, %p1090_p13 }
  0x61   : > { %918 = vmatpush1.bf16.msra.mxu0 %v917_v20  ;;  %v324_v46 = vld [vmem:[%s1384_s26 + $0x18] sm:$0xff]  ;;  %v325_v57 = vld [vmem:[%s1384_s26 + $0x20] sm:$0xff]  ;;  %v327_v58 = vld [vmem:[%s1384_s26 + $0x30] sm:$0xff] }
  0x62   : > { %920 = vmatprep.subr.bf16.mxu0 %v919_v21  ;;  %v326_v59 = vld [vmem:[%s1384_s26 + $0x28] sm:$0xff]  ;;  %v328_v60 = vld [vmem:[%s1384_s26 + $0x38] sm:$0xff] }
  0x65   : > { %922 = vmatpush1.bf16.msra.mxu0 %v921_v24  ;;  %v329_v24 = vld [vmem:[%s1384_s26 + $0x40] sm:$0xff] }
  0x68   : > { %883 = vmatmul.mubr.msk.f32.vlgmr.msra.gmra.mrb[0].mxu0 %vm353_vm0, %v281_v25  ;;  %v331_v25 = vld [vmem:[%s1384_s26 + $0x50] sm:$0xff] }
  0x69   : > { %472 = vmatprep.mubr.f32.mxu0 %v1179_v0 }
  0x6c   : > { %884 = vmatmul.mubr.msk.f32.gmra.mrb[2].mxu0 %vm353_vm0, %v282_v26  ;;  %v330_v26 = vld [vmem:[%s1384_s26 + $0x48] sm:$0xff] }
  0x6d   : > { %478 = vmatprep.mubr.f32.mxu0 %v1179_v0 }
  0x70   : > { %885 = vmatmul.mubr.msk.f32.gmra.mrb[4].mxu0 %vm353_vm0, %v283_v27  ;;  %v332_v27 = vld [vmem:[%s1384_s26 + $0x58] sm:$0xff] }
  0x71   : > { %484 = vmatprep.mubr.f32.mxu0 %v1179_v0 }
  0x74   : > { %886 = vmatmul.mubr.msk.f32.gmra.mrb[6].mxu0 %vm353_vm0, %v284_v28 }
  0x75   : > { %490 = vmatprep.mubr.f32.mxu0 %v1179_v0 }
  0x78   : > { %887 = vmatmul.mubr.msk.f32.gmra.mrb[8].mxu0 %vm353_vm0, %v285_v29 }
  0x79   : > { %496 = vmatprep.mubr.f32.mxu0 %v1179_v0 }
  0x7c   : > { %888 = vmatmul.mubr.msk.f32.gmra.mrb[10].mxu0 %vm353_vm0, %v286_v30 }
  0x7d   : > { %502 = vmatprep.mubr.f32.mxu0 %v1179_v0 }
  0x80   : > { %889 = vmatmul.mubr.msk.f32.gmra.mrb[12].mxu0 %vm353_vm0, %v287_v31 }
  0x81   : > { %508 = vmatprep.mubr.f32.mxu0 %v1179_v0 }
  0x84   : > { %890 = vmatmul.mubr.msk.f32.gmra.mrb[14].mxu0 %vm353_vm0, %v288_v32 }
  0x85   : > { %514 = vmatprep.mubr.f32.mxu0 %v1179_v0 }
  0x88   : > { %891 = vmatmul.mubr.msk.f32.gmra.mrb[16].mxu0 %vm353_vm0, %v289_v33 }
  0x89   : > { %520 = vmatprep.mubr.f32.mxu0 %v1179_v0 }
  0x8c   : > { %892 = vmatmul.mubr.msk.f32.gmra.mrb[18].mxu0 %vm353_vm0, %v290_v34 }
  0x8d   : > { %526 = vmatprep.mubr.f32.mxu0 %v1179_v0 }
  0x90   : > { %893 = vmatmul.mubr.msk.f32.gmra.mrb[20].mxu0 %vm353_vm0, %v291_v35 }
  0x91   : > { %532 = vmatprep.mubr.f32.mxu0 %v1179_v0 }
  0x94   : > { %894 = vmatmul.mubr.msk.f32.gmra.mrb[22].mxu0 %vm353_vm0, %v292_v36 }
  0x95   : > { %538 = vmatprep.mubr.f32.mxu0 %v1179_v0 }
  0x98   : > { %895 = vmatmul.mubr.msk.f32.gmra.mrb[24].mxu0 %vm353_vm0, %v293_v37 }
  0x99   : > { %544 = vmatprep.mubr.f32.mxu0 %v1179_v0 }
  0x9c   : > { %896 = vmatmul.mubr.msk.f32.gmra.mrb[26].mxu0 %vm353_vm0, %v294_v38  ;;  %v333_v38 = vld [vmem:[%s1384_s26 + $0x60] sm:$0xff] }
  0x9d   : > { %550 = vmatprep.mubr.f32.mxu0 %v1179_v0 }
  0xa0   : > { %897 = vmatmul.mubr.msk.f32.gmra.mrb[28].mxu0 %vm353_vm0, %v295_v39  ;;  %v335_v39 = vld [vmem:[%s1384_s26 + $0x70] sm:$0xff] }
  0xa1   : > { %556 = vmatprep.mubr.f32.mxu0 %v1179_v0 }
  0xa4   : > { %898 = vmatmul.mubr.msk.f32.gmra.mrb[30].mxu0 %vm353_vm0, %v296_v40  ;;  %v334_v40 = vld [vmem:[%s1384_s26 + $0x68] sm:$0xff] }
 0x13b   : > { %v468_v41 = vpop.f32.mrb[0].mxu0 }
 0x13c   : > { %v470_v42 = vpop.f32.mrb[1].mxu0  ;;  %v563_v48 = vmul.f32 %v468_v41, %v321_v43  ;;  %v336_v41 = vld [vmem:[%s1384_s26 + $0x78] sm:$0xff] }
 0x13d   : > { %v564_v51 = vmul.f32 %v470_v42, %v322_v45 }
 0x13f   : > { %v474_v47 = vpop.f32.mrb[2].mxu0 }
 0x140   : > { %v565_v49 = vmul.f32 %v474_v47, %v323_v44  ;;  %v476_v50 = vpop.f32.mrb[3].mxu0 }
 0x141   : > { %v566_v52 = vmul.f32 %v476_v50, %v324_v46 }
 0x142   : > { %v925_v53 = vpack.c.bf16 %v565_v49, %v563_v48 }
 0x143   : > { %v480_v54 = vpop.f32.mrb[4].mxu0  ;;  %v923_v55 = vpack.c.bf16 %v566_v52, %v564_v51  ;;  %v337_v52 = vld [vmem:[%s1384_s26 + $0x80] sm:$0xff] }
 0x144   : > { %v482_v56 = vpop.f32.mrb[5].mxu0  ;;  %v567_v62 = vmul.f32 %v480_v54, %v325_v57  ;;  %v338_v54 = vld [vmem:[%s1384_s26 + $0x88] sm:$0xff] }
 0x145   : > { %924 = vmatprep.subr.bf16.mxu1 %v923_v55  ;;  %v568_v8 = vmul.f32 %v482_v56, %v326_v59  ;;  %v340_v55 = vld [vmem:[%s1384_s26 + $0x98] sm:$0xff] }
 0x146   : > { %926 = vmatpush1.bf16.msra.mxu1 %v925_v53  ;;  %v339_v53 = vld [vmem:[%s1384_s26 + $0x90] sm:$0xff] }
 0x147   : > { %v486_v61 = vpop.f32.mrb[6].mxu0 }
 0x148   : > { %v569_v63 = vmul.f32 %v486_v61, %v327_v58  ;;  %v488_v4 = vpop.f32.mrb[7].mxu0 }
 0x149   : > { %v570_v9 = vmul.f32 %v488_v4, %v328_v60 }
 0x14a   : > { %v929_v14 = vpack.c.bf16 %v569_v63, %v567_v62 }
 0x14b   : > { %v927_v15 = vpack.c.bf16 %v570_v9, %v568_v8  ;;  %v492_v20 = vpop.f32.mrb[8].mxu0  ;;  %v341_v9 = vld [vmem:[%s1384_s26 + $0xa0] sm:$0xff] }
 0x14c   : > { %v494_v21 = vpop.f32.mrb[9].mxu0  ;;  %v571_v29 = vmul.f32 %v492_v20, %v329_v24  ;;  %v344_v20 = vld [vmem:[%s1384_s26 + $0xb8] sm:$0xff] }
 0x14d   : > { %928 = vmatprep.subr.bf16.mxu1 %v927_v15  ;;  %v572_v32 = vmul.f32 %v494_v21, %v330_v26  ;;  %v342_v15 = vld [vmem:[%s1384_s26 + $0xa8] sm:$0xff] }
 0x14e   : > { %930 = vmatpush1.bf16.msra.mxu1 %v929_v14  ;;  %v343_v14 = vld [vmem:[%s1384_s26 + $0xb0] sm:$0xff] }
 0x14f   : > { %v498_v28 = vpop.f32.mrb[10].mxu0 }
 0x150   : > { %v573_v30 = vmul.f32 %v498_v28, %v331_v25  ;;  %v500_v31 = vpop.f32.mrb[11].mxu0 }
 0x151   : > { %v574_v33 = vmul.f32 %v500_v31, %v332_v27 }
 0x152   : > { %v933_v34 = vpack.c.bf16 %v573_v30, %v571_v29 }
 0x153   : > { %v931_v35 = vpack.c.bf16 %v574_v33, %v572_v32  ;;  %v504_v36 = vpop.f32.mrb[12].mxu0  ;;  %v345_v33 = vld [vmem:[%s1384_s26 + $0xc0] sm:$0xff] }
 0x154   : > { %v506_v37 = vpop.f32.mrb[13].mxu0  ;;  %v575_v43 = vmul.f32 %v504_v36, %v333_v38  ;;  %v348_v36 = vld [vmem:[%s1384_s26 + $0xd8] sm:$0xff] }
 0x155   : > { %932 = vmatprep.subr.bf16.mxu1 %v931_v35  ;;  %v576_v46 = vmul.f32 %v506_v37, %v334_v40  ;;  %v346_v35 = vld [vmem:[%s1384_s26 + $0xc8] sm:$0xff] }
 0x156   : > { %934 = vmatpush1.bf16.msra.mxu1 %v933_v34  ;;  %v347_v34 = vld [vmem:[%s1384_s26 + $0xd0] sm:$0xff] }
 0x157   : > { %v510_v42 = vpop.f32.mrb[14].mxu0 }
 0x158   : > { %v577_v44 = vmul.f32 %v510_v42, %v335_v39  ;;  %v512_v45 = vpop.f32.mrb[15].mxu0 }
 0x159   : > { %v578_v47 = vmul.f32 %v512_v45, %v336_v41 }
 0x15a   : > { %v937_v48 = vpack.c.bf16 %v577_v44, %v575_v43 }
 0x15b   : > { %v935_v49 = vpack.c.bf16 %v578_v47, %v576_v46  ;;  %v516_v50 = vpop.f32.mrb[16].mxu0  ;;  %v349_v47 = vld [vmem:[%s1384_s26 + $0xe0] sm:$0xff] }
 0x15c   : > { %v518_v51 = vpop.f32.mrb[17].mxu0  ;;  %v579_v57 = vmul.f32 %v516_v50, %v337_v52  ;;  %v352_v50 = vld [vmem:[%s1384_s26 + $0xf8] sm:$0xff] }
 0x15d   : > { %936 = vmatprep.subr.bf16.mxu1 %v935_v49  ;;  %v580_v60 = vmul.f32 %v518_v51, %v338_v54  ;;  %v350_v49 = vld [vmem:[%s1384_s26 + $0xe8] sm:$0xff] }
 0x15e   : > { %938 = vmatpush1.bf16.msra.mxu1 %v937_v48  ;;  %v351_v48 = vld [vmem:[%s1384_s26 + $0xf0] sm:$0xff] }
 0x15f   : > { %v522_v56 = vpop.f32.mrb[18].mxu0 }
 0x160   : > { %v581_v58 = vmul.f32 %v522_v56, %v339_v53  ;;  %v524_v59 = vpop.f32.mrb[19].mxu0 }
 0x161   : > { %v582_v61 = vmul.f32 %v524_v59, %v340_v55  ;;  %v297_v59 = vld [vmem:[%s1693_s3] sm:$0xff] }
 0x162   : > { %v941_v62 = vpack.c.bf16 %v581_v58, %v579_v57 }
 0x163   : > { %v939_v63 = vpack.c.bf16 %v582_v61, %v580_v60  ;;  %v528_v4 = vpop.f32.mrb[20].mxu0  ;;  %v298_v60 = vld [vmem:[%s1693_s3 + $0x8] sm:$0xff]  ;;  %v299_v61 = vld [vmem:[%s1693_s3 + $0x10] sm:$0xff] }
 0x164   : > { %v530_v8 = vpop.f32.mrb[21].mxu0  ;;  %v583_v24 = vmul.f32 %v528_v4, %v341_v9  ;;  %v302_v4 = vld [vmem:[%s1693_s3 + $0x28] sm:$0xff]  ;;  %v304_v9 = vld [vmem:[%s1693_s3 + $0x38] sm:$0xff] }
 0x165   : > { %940 = vmatprep.subr.bf16.mxu1 %v939_v63  ;;  %v584_v27 = vmul.f32 %v530_v8, %v342_v15  ;;  %v301_v63 = vld [vmem:[%s1693_s3 + $0x20] sm:$0xff]  ;;  %v303_v8 = vld [vmem:[%s1693_s3 + $0x30] sm:$0xff] }
 0x166   : > { %942 = vmatpush1.bf16.msra.mxu1 %v941_v62  ;;  %v300_v62 = vld [vmem:[%s1693_s3 + $0x18] sm:$0xff] }
 0x167   : > { %v534_v21 = vpop.f32.mrb[22].mxu0 }
 0x168   : > { %v585_v25 = vmul.f32 %v534_v21, %v343_v14  ;;  %v536_v26 = vpop.f32.mrb[23].mxu0 }
 0x169   : > { %v586_v28 = vmul.f32 %v536_v26, %v344_v20 }
 0x16a   : > { %v945_v29 = vpack.c.bf16 %v585_v25, %v583_v24 }
 0x16b   : > { %v943_v30 = vpack.c.bf16 %v586_v28, %v584_v27  ;;  %v540_v31 = vpop.f32.mrb[24].mxu0 }
 0x16c   : > { %v542_v32 = vpop.f32.mrb[25].mxu0  ;;  %v587_v38 = vmul.f32 %v540_v31, %v345_v33 }
 0x16d   : > { %944 = vmatprep.subr.bf16.mxu1 %v943_v30  ;;  %v588_v41 = vmul.f32 %v542_v32, %v346_v35 }
 0x16e   : > { %946 = vmatpush1.bf16.msra.mxu1 %v945_v29 }
 0x16f   : > { %v546_v37 = vpop.f32.mrb[26].mxu0 }
 0x170   : > { %v589_v39 = vmul.f32 %v546_v37, %v347_v34  ;;  %v548_v40 = vpop.f32.mrb[27].mxu0 }
 0x171   : > { %v590_v42 = vmul.f32 %v548_v40, %v348_v36 }
 0x172   : > { %v949_v43 = vpack.c.bf16 %v589_v39, %v587_v38 }
 0x173   : > { %v947_v44 = vpack.c.bf16 %v590_v42, %v588_v41  ;;  %v552_v45 = vpop.f32.mrb[28].mxu0 }
 0x174   : > { %v554_v46 = vpop.f32.mrb[29].mxu0  ;;  %v591_v52 = vmul.f32 %v552_v45, %v349_v47 }
 0x175   : > { %948 = vmatprep.subr.bf16.mxu1 %v947_v44  ;;  %v592_v55 = vmul.f32 %v554_v46, %v350_v49 }
 0x176   : > { %950 = vmatpush1.bf16.msra.mxu1 %v949_v43 }
 0x177   : > { %v558_v51 = vpop.f32.mrb[30].mxu0 }
 0x178   : > { %v593_v53 = vmul.f32 %v558_v51, %v351_v48  ;;  %v560_v54 = vpop.f32.mrb[31].mxu0 }
 0x179   : > { %v594_v56 = vmul.f32 %v560_v54, %v352_v50 }
 0x17a   : > { %v953_v57 = vpack.c.bf16 %v593_v53, %v591_v52 }
 0x17b   : > { %v951_v58 = vpack.c.bf16 %v594_v56, %v592_v55 }
 0x17d   : > { %952 = vmatprep.subr.bf16.mxu1 %v951_v58 }
 0x17e   : > { %954 = vmatpush1.bf16.msra.mxu1 %v953_v57 }
 0x181   : > { %660 = vmatmul.mubr.f32.vlgmr.msra.gmra.mrb[0].mxu1 %v297_v59 }
 0x182   : > { %665 = vmatprep.mubr.f32.mxu1 %v1179_v0 }
 0x185   : > { %666 = vmatmul.mubr.f32.gmra.mrb[2].mxu1 %v298_v60 }
 0x186   : > { %671 = vmatprep.mubr.f32.mxu1 %v1179_v0 }
 0x189   : > { %672 = vmatmul.mubr.f32.gmra.mrb[4].mxu1 %v299_v61 }
 0x18a   : > { %677 = vmatprep.mubr.f32.mxu1 %v1179_v0 }
 0x18d   : > { %678 = vmatmul.mubr.f32.gmra.mrb[6].mxu1 %v300_v62 }
 0x18e   : > { %683 = vmatprep.mubr.f32.mxu1 %v1179_v0 }
 0x191   : > { %684 = vmatmul.mubr.f32.gmra.mrb[8].mxu1 %v301_v63 }
 0x192   : > { %689 = vmatprep.mubr.f32.mxu1 %v1179_v0 }
 0x195   : > { %690 = vmatmul.mubr.f32.gmra.mrb[10].mxu1 %v302_v4 }
 0x196   : > { %695 = vmatprep.mubr.f32.mxu1 %v1179_v0 }
 0x199   : > { %696 = vmatmul.mubr.f32.gmra.mrb[12].mxu1 %v303_v8 }
 0x19a   : > { %701 = vmatprep.mubr.f32.mxu1 %v1179_v0 }
 0x19d   : > { %702 = vmatmul.mubr.f32.gmra.mrb[14].mxu1 %v304_v9 }
 0x254   : > { %v661_v14 = vpop.f32.mrb[0].mxu1 }
 0x255   : > { %v708_v15 = vadd.f32 %v661_v14, %v1399_v3  ;;  %v663_v20 = vpop.f32.mrb[1].mxu1 }
 0x256   : > { %v709_v21 = vadd.f32 %v663_v20, %v1393_v1 }
 0x257   : > { %724 = vst [vmem:[%s1602_s12] sm:$0xff] %v708_v15 }
 0x258   : > { %725 = vst [vmem:[%s1602_s12 + $0x8] sm:$0xff] %v709_v21  ;;  %v667_v0 = vpop.f32.mrb[2].mxu1 }
 0x259   : > { %v710_v24 = vadd.f32 %v667_v0, %v1404_v5  ;;  %v669_v3 = vpop.f32.mrb[3].mxu1 }
 0x25a   : > { %v711_v25 = vadd.f32 %v669_v3, %v1396_v2 }
 0x25b   : > { %726 = vst [vmem:[%s1602_s12 + $0x10] sm:$0xff] %v710_v24 }
 0x25c   : > { %727 = vst [vmem:[%s1602_s12 + $0x18] sm:$0xff] %v711_v25  ;;  %v673_v1 = vpop.f32.mrb[4].mxu1 }
 0x25d   : > { %v712_v26 = vadd.f32 %v673_v1, %v1417_v10  ;;  %v675_v27 = vpop.f32.mrb[5].mxu1 }
 0x25e   : > { %v713_v28 = vadd.f32 %v675_v27, %v1407_v6 }
 0x25f   : > { %728 = vst [vmem:[%s1602_s12 + $0x20] sm:$0xff] %v712_v26 }
 0x260   : > { %729 = vst [vmem:[%s1602_s12 + $0x28] sm:$0xff] %v713_v28  ;;  %v679_v29 = vpop.f32.mrb[6].mxu1 }
 0x261   : > { %v714_v5 = vadd.f32 %v679_v29, %v1420_v11  ;;  %v681_v30 = vpop.f32.mrb[7].mxu1 }
 0x262   : > { %v715_v2 = vadd.f32 %v681_v30, %v1410_v7 }
 0x263   : > { %730 = vst [vmem:[%s1602_s12 + $0x30] sm:$0xff] %v714_v5 }
 0x264   : > { %731 = vst [vmem:[%s1602_s12 + $0x38] sm:$0xff] %v715_v2  ;;  %v685_v31 = vpop.f32.mrb[8].mxu1 }
 0x265   : > { %v716_v10 = vadd.f32 %v685_v31, %v1433_v16  ;;  %v687_v32 = vpop.f32.mrb[9].mxu1 }
 0x266   : > { %v717_v6 = vadd.f32 %v687_v32, %v1423_v12 }
 0x267   : > { %732 = vst [vmem:[%s1602_s12 + $0x40] sm:$0xff] %v716_v10 }
 0x268   : > { %733 = vst [vmem:[%s1602_s12 + $0x48] sm:$0xff] %v717_v6  ;;  %v691_v33 = vpop.f32.mrb[10].mxu1 }
 0x269   : > { %v718_v11 = vadd.f32 %v691_v33, %v1436_v17  ;;  %v693_v34 = vpop.f32.mrb[11].mxu1 }
 0x26a   : > { %v719_v7 = vadd.f32 %v693_v34, %v1426_v13 }
 0x26b   : > { %734 = vst [vmem:[%s1602_s12 + $0x50] sm:$0xff] %v718_v11 }
 0x26c   : > { %735 = vst [vmem:[%s1602_s12 + $0x58] sm:$0xff] %v719_v7  ;;  %v697_v35 = vpop.f32.mrb[12].mxu1 }
 0x26d   : > { %v720_v16 = vadd.f32 %v697_v35, %v1449_v22  ;;  %v699_v36 = vpop.f32.mrb[13].mxu1 }
 0x26e   : > { %v721_v12 = vadd.f32 %v699_v36, %v1439_v18 }
 0x26f   : > { %736 = vst [vmem:[%s1602_s12 + $0x60] sm:$0xff] %v720_v16 }
 0x270   : > { %737 = vst [vmem:[%s1602_s12 + $0x68] sm:$0xff] %v721_v12  ;;  %v703_v17 = vpop.f32.mrb[14].mxu1 }
 0x271   : > { %v722_v37 = vadd.f32 %v703_v17, %v1452_v23  ;;  %v705_v13 = vpop.f32.mrb[15].mxu1 }
 0x272   : > { %v723_v18 = vadd.f32 %v705_v13, %v1442_v19 }
 0x273   : > { %738 = vst [vmem:[%s1602_s12 + $0x70] sm:$0xff] %v722_v37 }
 0x274   : > { %739 = vst [vmem:[%s1602_s12 + $0x78] sm:$0xff] %v723_v18 }
 0x275   : > { %1100 = shalt.err (!%p1097_p11)
}
 0x276   : > { %s1101_s10 = scalar_lea.hbm %s1636_s5, 2048  ;;  %s1105_s9 = scalar_lea.hbm %s1694_s4, 4096 }
 0x277   : > { %p1102_p1 = scmp.ne.s32.totalorder %s1636_s5, %s1101_s10  ;;  %p1106_p5 = scmp.lt.u32.totalorder %s1636_s5, %s1694_s4 }
 0x278   : > { %p1107_p4 = scmp.lt.u32.totalorder %s1105_s9, %s1101_s10  ;;  %p1109_p0 = scmp.lt.u32.totalorder %s1101_s10, %s1636_s5 }
 0x279   : > { %p1103_p6 = pnand %p1102_p1, %p1707_p3 }
 0x27a   : > { %p1108_p8 = por %p1107_p4, %p1106_p5 }
 0x27b   : > { %p1104_p2 = pneg %p1103_p6 }
 0x27c   : > { %p1110_p12 = por %p1109_p0, %p1108_p8 }
 0x27e   : > { %p1111_p13 = pnand %p1110_p12, %p1104_p2 }
 0x280   : > { %1114 = shalt.err (!%p1111_p13)
}
 0x281   : > { %s1181_s6 = smov 256   ;;  %s1182_s26 = smov 16  }
 0x282   : > { %959 = dma.vmem_to_hbm [thread:$0]  (%p1707_p3), %s1638_s13, 2048, %s1636_s5, %s741_s18, %s1181_s6, %s1181_s6, %s1182_s26  }
 0x283 PF: > { %s771_s7 = sand.u32 1, %s1153_s15   ;;  %p1708_p7 = scmp.ne.s32.totalorder %s1701_s30, 0 }
 0x284   : > { %p1709_p10 = scmp.ge.s32.totalorder %s1173_s20, 2  ;;  %s772_s22 = scalar_lea.sflag [#allocation4], %s771_s7 }
 0x286   : > { %p969_p9 = pnand %p1709_p10, %p1708_p7 }
 0x288   : > { %1148 = dma.done.wait (!%p969_p9), %s772_s22, 2048  }
 0x289   : > { %1150 = vsyncadd (!%p969_p9), %s772_s22, 4294965248  ;;  %s23_s20 = sadd.s32 1, %s1173_s20   ;;  %s1710_s15 = smov %s1157_s16 }
 0x28a   : > { %p20_p11 = scmp.ge.s32.totalorder %s23_s20, 4   ;;  %s1711_s16 = smov %s1161_s17 }
 0x28b   : > { %s1712_s17 = smov %s1264_s29  ;;  %s1713_s18 = smov %s1169_s19 }
 0x28c   : > { %s1714_s19 = smov %s1716_s23  ;;  %22 = sbr.rel (!%p20_p11) target bundleno = 8 (0x8), region = 94 }
 0x293   :  { %777 = vsyncpa [#allocation3], 1 }
 0x294   :  { %779 = vsyncpa [#allocation3 + $0x1], 1 }
 0x295   :  { %780 = vsyncpa [#allocation6], 1 }
 0x296   :  { %782 = vsyncpa [#allocation6 + $0x1], 1 }
 0x297   :  { %783 = vsyncpa [#allocation4], 1 }
 0x298   :  { %785 = vsyncpa [#allocation4 + $0x1], 1 }

</bundles_post_ra>
